<compile_context>
chip_gen: v5e
topology: v5e:2x2
jax: 0.10.0
libtpu: 0.0.40
codegen_flags: <defaults>
</compile_context>

<pallas_src>
import jax
import jax.numpy as jnp
from jax.experimental import pallas as pl
from jax.experimental.pallas import tpu as pltpu


def _pred_decoder_kernel(p_ref, w1_ref, b1_ref, w2_ref, b2_ref, o_ref):
    # p_ref : (1, 9*Cin, H*W)  bf16   im2col patches for one image
    # w1_ref: (Chid, 9*Cin)    bf16   3x3 conv weights, channels-as-rows
    # b1_ref: (Chid, 1)        f32
    # w2_ref: (Cout, Chid)     bf16   1x1 conv weights, channels-as-rows
    # b2_ref: (Cout, 1)        f32
    # o_ref : (1, Cout, H*W)   f32    lane-dense output (natively NCHW)
    h = jnp.dot(w1_ref[...], p_ref[0],
                preferred_element_type=jnp.float32)          # (Chid, HW)
    h = jnp.maximum(h + b1_ref[...], 0.0)                    # f32 bias+ReLU on VPU
    out = jnp.dot(w2_ref[...], h.astype(w2_ref.dtype),
                  preferred_element_type=jnp.float32) + b2_ref[...]
    o_ref[0] = out.astype(o_ref.dtype)                       # (Cout, HW) lane-dense


def pred_decoder_forward(x_nchw, w1, b1, w2, b2):
    """x_nchw: (N, Cin, H, W) f32 (PyTorch layout). w1: (3,3,Cin,Chid),
    b1: (1,Chid), w2: (Chid,Cout), b2: (1,Cout). Returns (N, Cout, H, W) f32."""
    N, Cin, H, W = x_nchw.shape
    Chid = w1.shape[-1]
    Cout = w2.shape[-1]
    HW = H * W
    K = 9 * Cin

    # Pad + im2col fused in one XLA op chain, staying in NCHW-derived layout
    # (channels/taps on the sublane axis, H*W on the lane axis).
    xp = jnp.pad(x_nchw, ((0, 0), (0, 0), (1, 1), (1, 1)))
    taps = [xp[:, :, ky:ky + H, kx:kx + W] for ky in range(3) for kx in range(3)]
    patches = jnp.stack(taps, axis=1).reshape(N, K, HW).astype(jnp.bfloat16)

    # Weights in channels-as-rows layout; K ordered as (tap, cin) to match patches.
    w1r = jnp.transpose(w1, (3, 0, 1, 2)).reshape(Chid, K).astype(jnp.bfloat16)
    b1r = b1.reshape(Chid, 1).astype(jnp.float32)
    w2r = jnp.transpose(w2, (1, 0)).astype(jnp.bfloat16)      # (Cout, Chid)
    b2r = b2.reshape(Cout, 1).astype(jnp.float32)

    out = pl.pallas_call(
        _pred_decoder_kernel,
        out_shape=jax.ShapeDtypeStruct((N, Cout, HW), jnp.float32),
        grid_spec=pltpu.PrefetchScalarGridSpec(
            num_scalar_prefetch=0,
            grid=(N,),
            in_specs=[
                pl.BlockSpec((1, K, HW), lambda n: (n, 0, 0)),
                pl.BlockSpec((Chid, K), lambda n: (0, 0)),
                pl.BlockSpec((Chid, 1), lambda n: (0, 0)),
                pl.BlockSpec((Cout, Chid), lambda n: (0, 0)),
                pl.BlockSpec((Cout, 1), lambda n: (0, 0)),
            ],
            out_specs=pl.BlockSpec((1, Cout, HW), lambda n: (n, 0, 0)),
        ),
        compiler_params=pltpu.CompilerParams(
            dimension_semantics=("parallel",)),
    )(patches, w1r, b1r, w2r, b2r)

    # Output is already (N, Cout, H*W) in NCHW order — reshape is free.
    return out.reshape(N, Cout, H, W)


def _reference(x_nchw, w1, b1, w2, b2):
    # pure-JAX f32 reference for correctness check
    x = jnp.transpose(x_nchw, (0, 2, 3, 1))
    xp = jnp.pad(x, ((0, 0), (1, 1), (1, 1), (0, 0)))
    N, H, W, Cin = x.shape
    acc = jnp.zeros((N, H, W, w1.shape[-1]), jnp.float32)
    for ky in range(3):
        for kx in range(3):
            acc = acc + jnp.einsum('nhwc,cd->nhwd',
                                   xp[:, ky:ky + H, kx:kx + W, :], w1[ky, kx])
    h = jnp.maximum(acc + b1[0], 0.0)
    out = jnp.einsum('nhwd,de->nhwe', h, w2) + b2[0]
    return jnp.transpose(out, (0, 3, 1, 2))


if __name__ == "__main__":
    key = jax.random.PRNGKey(0)
    k_x, k_w1, k_b1, k_w2, k_b2 = jax.random.split(key, 5)

    N, Cin, H, W = 2, 4, 16, 16
    Chid, Cout = 8, 6

    x = jax.random.normal(k_x, (N, Cin, H, W), jnp.float32)
    w1 = jax.random.normal(k_w1, (3, 3, Cin, Chid), jnp.float32) * 0.1
    b1 = jax.random.normal(k_b1, (1, Chid), jnp.float32) * 0.1
    w2 = jax.random.normal(k_w2, (Chid, Cout), jnp.float32) * 0.1
    b2 = jax.random.normal(k_b2, (1, Cout), jnp.float32) * 0.1

    out = pred_decoder_forward(x, w1, b1, w2, b2)
    out = jax.block_until_ready(out)

    ref = _reference(x, w1, b1, w2, b2)
    assert out.shape == (N, Cout, H, W), out.shape
    # bf16 MXU operands in the kernel vs. pure-f32 reference -> looser tolerance.
    err = float(jnp.max(jnp.abs(out - ref)))
    assert jnp.allclose(out, ref, atol=5e-2, rtol=5e-2), err
    print("KERNEL_OK")
</pallas_src>

<mosaic_0001>
module attributes {stable_mosaic.version = 11 : i64} {
  func.func @_pred_decoder_kernel(%arg0: i32, %arg1: memref<1x36x256xbf16, #tpu.memory_space<vmem>>, %arg2: memref<8x36xbf16, #tpu.memory_space<vmem>>, %arg3: memref<8x1xf32, #tpu.memory_space<vmem>>, %arg4: memref<6x8xbf16, #tpu.memory_space<vmem>>, %arg5: memref<6x1xf32, #tpu.memory_space<vmem>>, %arg6: memref<1x6x256xf32, #tpu.memory_space<vmem>>) attributes {dimension_semantics = [#tpu.dimension_semantics<parallel>], iteration_bounds = array<i64: 2>, scalar_prefetch = 0 : i64, scratch_operands = 0 : i64, tpu.core_type = #tpu.core_type<tc>, window_params = [{transform_indices = @transform_0, window_bounds = array<i64: 1, 36, 256>}, {pipeline_mode = #tpu.pipeline_mode<synchronous>, transform_indices = @transform_1, window_bounds = array<i64: 8, 36>}, {pipeline_mode = #tpu.pipeline_mode<synchronous>, transform_indices = @transform_2, window_bounds = array<i64: 8, 1>}, {pipeline_mode = #tpu.pipeline_mode<synchronous>, transform_indices = @transform_3, window_bounds = array<i64: 6, 8>}, {pipeline_mode = #tpu.pipeline_mode<synchronous>, transform_indices = @transform_4, window_bounds = array<i64: 6, 1>}, {transform_indices = @transform_5, window_bounds = array<i64: 1, 6, 256>}]} {
    %c0 = arith.constant 0 : index
    %c0_0 = arith.constant 0 : index
    %0 = vector.load %arg2[%c0, %c0_0] : memref<8x36xbf16, #tpu.memory_space<vmem>>, vector<8x36xbf16>
    %c0_1 = arith.constant 0 : index
    %c0_2 = arith.constant 0 : index
    %c0_3 = arith.constant 0 : index
    %1 = vector.load %arg1[%c0_1, %c0_2, %c0_3] : memref<1x36x256xbf16, #tpu.memory_space<vmem>>, vector<1x36x256xbf16>
    %2 = vector.shape_cast %1 : vector<1x36x256xbf16> to vector<36x256xbf16>
    %cst = arith.constant dense<0.000000e+00> : vector<8x256xf32>
    %3 = tpu.matmul %0, %2, %cst {dimension_numbers = #tpu.dot_dimension_numbers<[1], [0], [0], [1], [0, 0, 1, 1], [], []>} : vector<8x36xbf16>, vector<36x256xbf16>, vector<8x256xf32> -> vector<8x256xf32>
    %c0_4 = arith.constant 0 : index
    %c0_5 = arith.constant 0 : index
    %4 = vector.load %arg3[%c0_4, %c0_5] : memref<8x1xf32, #tpu.memory_space<vmem>>, vector<8x1xf32>
    %5 = vector.broadcast %4 : vector<8x1xf32> to vector<8x256xf32>
    %6 = arith.addf %3, %5 : vector<8x256xf32>
    %cst_6 = arith.constant 0.000000e+00 : f32
    %7 = vector.broadcast %cst_6 : f32 to vector<8x256xf32>
    %8 = arith.maximumf %6, %7 : vector<8x256xf32>
    %c0_7 = arith.constant 0 : index
    %c0_8 = arith.constant 0 : index
    %9 = vector.load %arg4[%c0_7, %c0_8] : memref<6x8xbf16, #tpu.memory_space<vmem>>, vector<6x8xbf16>
    %10 = arith.truncf %8 : vector<8x256xf32> to vector<8x256xbf16>
    %cst_9 = arith.constant dense<0.000000e+00> : vector<6x256xf32>
    %11 = tpu.matmul %9, %10, %cst_9 {dimension_numbers = #tpu.dot_dimension_numbers<[1], [0], [0], [1], [0, 0, 1, 1], [], []>} : vector<6x8xbf16>, vector<8x256xbf16>, vector<6x256xf32> -> vector<6x256xf32>
    %c0_10 = arith.constant 0 : index
    %c0_11 = arith.constant 0 : index
    %12 = vector.load %arg5[%c0_10, %c0_11] : memref<6x1xf32, #tpu.memory_space<vmem>>, vector<6x1xf32>
    %13 = vector.broadcast %12 : vector<6x1xf32> to vector<6x256xf32>
    %14 = arith.addf %11, %13 : vector<6x256xf32>
    %c0_12 = arith.constant 0 : index
    %c0_13 = arith.constant 0 : index
    %c0_14 = arith.constant 0 : index
    %15 = vector.load %arg6[%c0_12, %c0_13, %c0_14] : memref<1x6x256xf32, #tpu.memory_space<vmem>>, vector<1x6x256xf32>
    %16 = vector.shape_cast %15 : vector<1x6x256xf32> to vector<6x256xf32>
    %17 = vector.shape_cast %14 : vector<6x256xf32> to vector<1x6x256xf32>
    tpu.vector_store %arg6[%c0_12, %c0_13, %c0_14], %17 {strides = array<i32>} : memref<1x6x256xf32, #tpu.memory_space<vmem>>, vector<1x6x256xf32>,
    return
  }
  func.func @transform_0(%arg0: i32) -> (i32, i32, i32) {
    %c0_i32 = arith.constant 0 : i32
    %c0_i32_0 = arith.constant 0 : i32
    %c0_i32_1 = arith.constant 0 : i32
    return %arg0, %c0_i32, %c0_i32_0 : i32, i32, i32
  }
  func.func @transform_1(%arg0: i32) -> (i32, i32) {
    %c0_i32 = arith.constant 0 : i32
    %c0_i32_0 = arith.constant 0 : i32
    %c0_i32_1 = arith.constant 0 : i32
    return %c0_i32, %c0_i32_0 : i32, i32
  }
  func.func @transform_2(%arg0: i32) -> (i32, i32) {
    %c0_i32 = arith.constant 0 : i32
    %c0_i32_0 = arith.constant 0 : i32
    %c0_i32_1 = arith.constant 0 : i32
    return %c0_i32, %c0_i32_0 : i32, i32
  }
  func.func @transform_3(%arg0: i32) -> (i32, i32) {
    %c0_i32 = arith.constant 0 : i32
    %c0_i32_0 = arith.constant 0 : i32
    %c0_i32_1 = arith.constant 0 : i32
    return %c0_i32, %c0_i32_0 : i32, i32
  }
  func.func @transform_4(%arg0: i32) -> (i32, i32) {
    %c0_i32 = arith.constant 0 : i32
    %c0_i32_0 = arith.constant 0 : i32
    %c0_i32_1 = arith.constant 0 : i32
    return %c0_i32, %c0_i32_0 : i32, i32
  }
  func.func @transform_5(%arg0: i32) -> (i32, i32, i32) {
    %c0_i32 = arith.constant 0 : i32
    %c0_i32_0 = arith.constant 0 : i32
    %c0_i32_1 = arith.constant 0 : i32
    return %arg0, %c0_i32, %c0_i32_0 : i32, i32, i32
  }
}

</mosaic_0001>

<bundles_post_ra>
// kernel: tpu_custom_call.1
= control target key start
LH: loop header
LB: loop body
LE: loop exit
PB: predicated region body
PF: predicated region fallthrough
CT: control target
= control target key end

     0   :  { %s490_s18 = smov 0   ;;  %s523_s0 = inlined_call_operand.vmem [shape: bf16[2,36,256], index: 0, kind: input, shape index: {}]   ;;  %s524_s1 = inlined_call_operand.vmem [shape: bf16[8,36], index: 1, kind: input, shape index: {}]   ;;  %s525_s2 = inlined_call_operand.vmem [shape: f32[8,1], index: 2, kind: input, shape index: {}]   ;;  %s526_s3 = inlined_call_operand.vmem [shape: bf16[6,8], index: 3, kind: input, shape index: {}]   ;;  %s527_s4 = inlined_call_operand.vmem [shape: f32[6,1], index: 4, kind: input, shape index: {}]   ;;  %s528_s5 = inlined_call_operand.vmem [shape: f32[2,6,256], index: 5, kind: output, shape index: {}]  }
   0x1 LB: > { %s405_s19 = sadd.s32 4294967295, %s457_s18   ;;  %p409_p0 = scmp.ge.s32.totalorder %s457_s18, 1  ;;  %s457_s18 = sphi %s490_s18, %s15_s18  }
   0x2   : > { %p187_p1 = scmp.lt.s32.totalorder %s457_s18, 3 }
   0x4   : > { %p188_p2 = pnand %p409_p0, %p187_p1 }
   0x5   : > { %p215_p3 = scmp.lt.s32.totalorder (!%p188_p2), %s405_s19, 1 }
   0x6   : > { %191 = sbr.rel (%p188_p2) target bundleno = 309 (0x135), region = 40 }
   0xb   : > { %v459_v0 = vmov 0   ;;  %v232_v1 = vld [vmem:[%s525_s2] sm:$0xff]  ;;  %s530_s19 = smov (!%p215_p3, %s405_s19), 1  ;;  %vm267_vm0 = vcmask 1041408   ;;  %vm263_vm1 = vcmask 293888   ;;  %vm315_vm2 = vcmask 1043456  }
   0xc   : > { %450 = vset.pattern.permute.xlu0 %v459_v0  ;;  %s440_s22 = smul.u32 40, %s530_s19  ;;  %v305_v3 = vld [vmem:[%s527_s4] sm:$0x3f]  ;;  %vm311_vm3 = vcmask 64512   ;;  %s435_s7 = sshll.u32 %s530_s19, 4 }
   0xd   : > { %235 = vperm.xlu0 %450, %v232_v1   ;;  %v226_v22 = vld [vmem:[%s524_s1] sm:$0xf]  ;;  %s224_s10 = scalar_lea.vmem %s528_s5, %s435_s7 }
   0xe   : > { %s219_s25 = scalar_lea.vmem %s523_s0, %s440_s22  ;;  %v302_v36 = vld [vmem:[%s526_s3] sm:$0x7] }
   0xf   : > { %v231_v2 = vld [vmem:[%s219_s25 + $0x20] sm:$0x33]  ;;  %v423_v6 = vld [vmem:[%s219_s25 + $0x10] sm:$0xf]  ;;  %v439_v9 = vld [vmem:[%s219_s25 + $0x14] sm:$0xf0] }
  0x10   : > { %v251_v4 = vunpack.c.l.b16 %v231_v2  ;;  %v252_v5 = vunpack.c.h.b16 %v231_v2  ;;  %v438_v10 = vld [vmem:[%s219_s25 + $0x14] sm:$0xf]  ;;  %v425_v11 = vld [vmem:[%s219_s25 + $0x18] sm:$0xf0]  ;;  %v424_v14 = vor.u32 %v439_v9, %v423_v6  ;;  %v415_v16 = vld [vmem:[%s219_s25] sm:$0xf] }
  0x11   : > { %v428_v15 = vor.u32 %v438_v10, %v425_v11  ;;  %v437_v17 = vld [vmem:[%s219_s25 + $0x4] sm:$0xf0]  ;;  %v436_v18 = vld [vmem:[%s219_s25 + $0x4] sm:$0xf]  ;;  %v417_v19 = vld [vmem:[%s219_s25 + $0x8] sm:$0xf0] }
  0x12   : > { %v257_v7 = vpack.c.b16 %v251_v4, %v251_v4  ;;  %v258_v8 = vpack.c.b16 %v252_v5, %v252_v5  ;;  %v416_v20 = vor.u32 %v437_v17, %v415_v16  ;;  %v420_v21 = vor.u32 %v436_v18, %v417_v19 }
  0x14   : > { %v269_v12 = vsel %vm267_vm0, %v257_v7, 0  ;;  %v272_v13 = vsel %vm267_vm0, %v258_v8, 0 }
  0x15   : > { %308 = vperm.xlu0 %450, %v305_v3   ;;  %279 = vmatpush.bf16.msra.mxu0 %v269_v12 }
  0x16   : > { %292 = vmatpush.bf16.msra.mxu1 %v272_v13 }
  0x19   : > { %280 = vmatpush.bf16.msra.mxu0 %v424_v14 }
  0x1a   : > { %293 = vmatpush.bf16.msra.mxu1 %v428_v15 }
  0x1d   : > { %281 = vmatpush.bf16.msra.mxu0 %v416_v20 }
  0x1e   : > { %294 = vmatpush.bf16.msra.mxu1 %v420_v21 }
  0x20   : > { %429 = vmatmul.msk.bf16.vlgmr.msra.gmra.mxu0 %vm263_vm1, %v226_v22 }
  0x21   : > { %430 = vmatmul.msk.bf16.vlgmr.msra.gmra.mxu1 %vm263_vm1, %v226_v22 }
  0x7f   : > { %v236_v23 = vpop.permute.xlu0 %235 }
  0x87   : > { %v309_v37 = vpop.permute.xlu0 %308 }
  0x9d   : > { %v283_v24 = vpop.f32.mrf.mxu0 }
  0x9e   : > { %v296_v25 = vpop.f32.mrf.mxu1  ;;  %v284_v26 = vadd.f32 %v283_v24, %v236_v23 }
  0x9f   : > { %v297_v27 = vadd.f32 %v296_v25, %v236_v23 }
  0xa0   : > { %v300_v28 = vmax.f32 %v284_v26, 0.0 }
  0xa1   : > { %v301_v29 = vmax.f32 %v297_v27, 0.0 }
  0xa2   : > { %v303_v30 = vpack.c.bf16 %v300_v28, %v300_v28 }
  0xa3   : > { %v304_v31 = vpack.c.bf16 %v301_v29, %v301_v29 }
  0xa4   : > { %v317_v32 = vsel %vm315_vm2, %v303_v30, 0 }
  0xa5   : > { %v320_v33 = vsel %vm315_vm2, %v304_v31, 0  ;;  %v285_v34 = vpop.f32.mrf.mxu0  ;;  %329 = vmatpush.bf16.msra.mxu2 %v317_v32 }
  0xa6   : > { %v298_v35 = vpop.f32.mrf.mxu1  ;;  %342 = vmatpush.bf16.msra.mxu3 %v320_v33 }
  0xa8   : > { %431 = vmatmul.msk.bf16.vlgmr.msra.gmra.mxu2 %vm311_vm3, %v302_v36 }
  0xa9   : > { %432 = vmatmul.msk.bf16.vlgmr.msra.gmra.mxu3 %vm311_vm3, %v302_v36 }
 0x12b   : > { %v331_v38 = vpop.f32.mrf.mxu2 }
 0x12c   : > { %v344_v39 = vpop.f32.mrf.mxu3  ;;  %v332_v40 = vadd.f32 %v331_v38, %v309_v37 }
 0x12d   : > { %v345_v41 = vadd.f32 %v344_v39, %v309_v37 }
 0x12e   : > { %348 = vst [vmem:[%s224_s10] sm:$0x3f] %v332_v40 }
 0x12f   : > { %349 = vst [vmem:[%s224_s10 + $0x8] sm:$0x3f] %v345_v41 }
 0x133   : > { %v333_v42 = vpop.f32.mrf.mxu2 }
 0x134   : > { %v346_v43 = vpop.f32.mrf.mxu3 }
 0x135 PF: > { %s15_s18 = sadd.s32 1, %s457_s18  }
 0x136   : > { %p12_p4 = scmp.ge.s32.totalorder %s15_s18, 4  }
 0x138   :  { %14 = sbr.rel (!%p12_p4) target bundleno = 1 (0x1), region = 70 }

</bundles_post_ra>
